<compile_context>
chip_gen: v5e
topology: v5e:2x2
jax: 0.10.0
libtpu: 0.0.40
codegen_flags: <defaults>
</compile_context>

<pallas_src>
import functools

import jax
import jax.numpy as jnp
from jax import lax
from jax.experimental import pallas as pl
from jax.experimental.pallas import tpu as pltpu

ALL_LETTERS = 'abcdefghijklmnopqrstuvwxyz'
NUM_LETTERS = len(ALL_LETTERS)   # 26
NUM_HIDDEN = 128
NUM_OUTPUT = 2
BATCH = 1                        # init_hidden() in the original returns zeros(1, H)
OUT_PAD = 128                    # lane-dense logits slab width (>= NUM_OUTPUT)


def rnn_fused_kernel(num_output, idx_ref, h0_ref, wx_ref, wh_ref, b_ref,
                     out_ref, hid_ref):
    """Runs all T timesteps; weights and hidden state stay resident in VMEM."""
    T = idx_ref.shape[0]
    B, H = hid_ref.shape

    def step(t, carry):
        h, _ = carry
        idx = idx_ref[t]
        # Input is one-hot -> x @ W_x is simply row `idx` of the packed W_x.
        x_row = wx_ref[pl.ds(idx, 1), :]                               # (1, H+OUT_PAD)
        acc = (x_row
               + jnp.dot(h, wh_ref[...], preferred_element_type=jnp.float32)
               + b_ref[...])                                           # (B, H+OUT_PAD)
        # Both the new hidden state and the logits come from the SAME combined
        # (old-hidden) activations, exactly like the PyTorch forward().
        return acc[:, :H], acc[:, H:]

    h_final, logits = lax.fori_loop(
        0, T, step,
        (h0_ref[...], jnp.zeros((B, OUT_PAD), jnp.float32)),
        unroll=True)

    hid_ref[...] = h_final

    # Numerically-stable log-softmax over the first `num_output` lanes only
    # (the remaining lanes of the 128-wide slab are padding).
    lane = lax.broadcasted_iota(jnp.int32, logits.shape, 1)
    masked = jnp.where(lane < num_output, logits, -1e30)
    m = jnp.max(masked, axis=-1, keepdims=True)
    lse = jnp.log(jnp.sum(jnp.exp(masked - m), axis=-1, keepdims=True)) + m
    out_ref[...] = masked - lse


def rnn_forward_word(letter_idx, hidden0, wx, wh, b, *, num_output):
    """Run the whole word through the RNN in a single pallas_call.

    letter_idx: (T,) int32   hidden0: (B, H)
    wx: (I_pad, H+OUT_PAD)   wh: (H, H+OUT_PAD)   b: (1, H+OUT_PAD)
    Returns (log_probs (B, num_output), final hidden (B, H)).
    """
    B, H = hidden0.shape
    assert B == 1, "one-hot row-gather formulation assumes batch == 1"
    vmem = pl.BlockSpec(memory_space=pltpu.MemorySpace.VMEM)
    smem = pl.BlockSpec(memory_space=pltpu.MemorySpace.SMEM)
    out_pad, hid = pl.pallas_call(
        functools.partial(rnn_fused_kernel, num_output),
        out_shape=(jax.ShapeDtypeStruct((B, OUT_PAD), jnp.float32),
                   jax.ShapeDtypeStruct((B, H), jnp.float32)),
        in_specs=[smem, vmem, vmem, vmem, vmem],
        out_specs=(vmem, vmem),
    )(letter_idx, hidden0, wx, wh, b)
    return out_pad[:, :num_output], hid


def init_params(key, input_size, hidden_size, output_size):
    """PyTorch-style Linear init, stored as (in_features, out_features) == W.T."""
    fan_in = input_size + hidden_size
    bound = 1.0 / float(fan_in) ** 0.5
    k1, k2, k3, k4 = jax.random.split(key, 4)
    w_i2h = jax.random.uniform(k1, (fan_in, hidden_size), jnp.float32, -bound, bound)
    b_i2h = jax.random.uniform(k2, (hidden_size,), jnp.float32, -bound, bound)
    w_i2o = jax.random.uniform(k3, (fan_in, output_size), jnp.float32, -bound, bound)
    b_i2o = jax.random.uniform(k4, (output_size,), jnp.float32, -bound, bound)
    return w_i2h, b_i2h, w_i2o, b_i2o


def pack_params(w_i2h, b_i2h, w_i2o, b_i2o, input_size, hidden_size, output_size):
    """Column-pack i2h|i2o into one weight, split x/h rows, pad for TPU layout."""
    n_pack = hidden_size + OUT_PAD
    fan_in = input_size + hidden_size
    w = jnp.zeros((fan_in, n_pack), jnp.float32)
    w = w.at[:, :hidden_size].set(w_i2h)
    w = w.at[:, hidden_size:hidden_size + output_size].set(w_i2o)
    b = jnp.zeros((1, n_pack), jnp.float32)
    b = b.at[0, :hidden_size].set(b_i2h)
    b = b.at[0, hidden_size:hidden_size + output_size].set(b_i2o)
    rows_pad = -(-input_size // 8) * 8                      # sublane-align the gather table
    wx = jnp.zeros((rows_pad, n_pack), jnp.float32).at[:input_size].set(w[:input_size])
    wh = w[input_size:]
    return wx, wh, b


def rnn_reference(x_seq, hidden0, w_i2h, b_i2h, w_i2o, b_i2o):
    """Pure-JAX replica of the PyTorch forward(), looped over the word."""
    h = hidden0
    out = None
    for t in range(x_seq.shape[0]):
        comb = jnp.concatenate([x_seq[t], h], axis=1)
        new_h = comb @ w_i2h + b_i2h
        logits = comb @ w_i2o + b_i2o
        out = jax.nn.log_softmax(logits, axis=1)
        h = new_h
    return out, h


def line_to_tensor(line):
    """One-hot encode a line: (T, 1, 26), mirroring the PyTorch helper."""
    t = jnp.zeros((len(line), 1, NUM_LETTERS), jnp.float32)
    for li, letter in enumerate(line):
        t = t.at[li, 0, ALL_LETTERS.index(letter)].set(1.0)
    return t


def line_to_indices(line):
    return jnp.array([ALL_LETTERS.index(c) for c in line], jnp.int32)


if __name__ == "__main__":
    key = jax.random.PRNGKey(0)
    w_i2h, b_i2h, w_i2o, b_i2o = init_params(key, NUM_LETTERS, NUM_HIDDEN, NUM_OUTPUT)
    wx, wh, b = pack_params(w_i2h, b_i2h, w_i2o, b_i2o,
                            NUM_LETTERS, NUM_HIDDEN, NUM_OUTPUT)

    # init_hidden(): zeros(1, hidden_size)
    hidden0 = jnp.zeros((BATCH, NUM_HIDDEN), jnp.float32)

    word = "word"
    letter_idx = line_to_indices(word)                     # (4,) int32

    fwd = jax.jit(functools.partial(rnn_forward_word, num_output=NUM_OUTPUT))
    output, hidden = fwd(letter_idx, hidden0, wx, wh, b)
    jax.block_until_ready((output, hidden))

    # shape / probability sanity
    assert output.shape == (BATCH, NUM_OUTPUT)
    assert hidden.shape == (BATCH, NUM_HIDDEN)
    assert jnp.allclose(jnp.sum(jnp.exp(output), axis=1), 1.0, atol=1e-5)

    # cross-check against a pure-JAX replica of the original cat-based forward()
    x_seq = line_to_tensor(word)
    out_ref, hid_ref = rnn_reference(x_seq, hidden0, w_i2h, b_i2h, w_i2o, b_i2o)
    assert jnp.allclose(output, out_ref, atol=2e-3)
    assert jnp.allclose(hidden, hid_ref, atol=2e-3)

    # TODO(synk): with B=1 and a sequential recurrence the MXU/second-TC are idle;
    # batching many words (B a multiple of 8+) is the only path to real utilization.
    print("KERNEL_OK")
</pallas_src>

<mosaic_0001>
module attributes {stable_mosaic.version = 11 : i64} {
  func.func @rnn_fused_kernel(%arg0: memref<4xi32, #tpu.memory_space<smem>>, %arg1: memref<1x128xf32, #tpu.memory_space<vmem>>, %arg2: memref<32x256xf32, #tpu.memory_space<vmem>>, %arg3: memref<128x256xf32, #tpu.memory_space<vmem>>, %arg4: memref<1x256xf32, #tpu.memory_space<vmem>>, %arg5: memref<1x128xf32, #tpu.memory_space<vmem>>, %arg6: memref<1x128xf32, #tpu.memory_space<vmem>>) attributes {dimension_semantics = [], scalar_prefetch = 0 : i64, scratch_operands = 0 : i64, tpu.core_type = #tpu.core_type<tc>} {
    %c0 = arith.constant 0 : index
    %c0_0 = arith.constant 0 : index
    %0 = vector.load %arg1[%c0, %c0_0] : memref<1x128xf32, #tpu.memory_space<vmem>>, vector<1x128xf32>
    %cst = arith.constant 0.000000e+00 : f32
    %1 = vector.broadcast %cst : f32 to vector<1x128xf32>
    %c0_i32 = arith.constant 0 : i32
    %2 = arith.index_cast %c0_i32 : i32 to index
    %3 = memref.load %arg0[%2] : memref<4xi32, #tpu.memory_space<smem>>
    %4 = arith.index_cast %3 : i32 to index
    %c0_1 = arith.constant 0 : index
    %5 = vector.load %arg2[%4, %c0_1] : memref<32x256xf32, #tpu.memory_space<vmem>>, vector<1x256xf32>
    %c0_2 = arith.constant 0 : index
    %c0_3 = arith.constant 0 : index
    %6 = vector.load %arg3[%c0_2, %c0_3] : memref<128x256xf32, #tpu.memory_space<vmem>>, vector<128x256xf32>
    %cst_4 = arith.constant dense<0.000000e+00> : vector<1x256xf32>
    %7 = tpu.matmul %0, %6, %cst_4 {dimension_numbers = #tpu.dot_dimension_numbers<[1], [0], [0], [1], [0, 0, 1, 1], [], []>} : vector<1x128xf32>, vector<128x256xf32>, vector<1x256xf32> -> vector<1x256xf32>
    %8 = arith.addf %5, %7 : vector<1x256xf32>
    %c0_5 = arith.constant 0 : index
    %c0_6 = arith.constant 0 : index
    %9 = vector.load %arg4[%c0_5, %c0_6] : memref<1x256xf32, #tpu.memory_space<vmem>>, vector<1x256xf32>
    %10 = arith.addf %8, %9 : vector<1x256xf32>
    %11 = vector.extract_strided_slice %10 {offsets = [0, 0], sizes = [1, 128], strides = [1, 1]} : vector<1x256xf32> to vector<1x128xf32>
    %12 = vector.extract_strided_slice %10 {offsets = [0, 128], sizes = [1, 128], strides = [1, 1]} : vector<1x256xf32> to vector<1x128xf32>
    %c1_i32 = arith.constant 1 : i32
    %13 = arith.index_cast %c1_i32 : i32 to index
    %14 = memref.load %arg0[%13] : memref<4xi32, #tpu.memory_space<smem>>
    %15 = arith.index_cast %14 : i32 to index
    %c0_7 = arith.constant 0 : index
    %16 = vector.load %arg2[%15, %c0_7] : memref<32x256xf32, #tpu.memory_space<vmem>>, vector<1x256xf32>
    %c0_8 = arith.constant 0 : index
    %c0_9 = arith.constant 0 : index
    %17 = vector.load %arg3[%c0_8, %c0_9] : memref<128x256xf32, #tpu.memory_space<vmem>>, vector<128x256xf32>
    %cst_10 = arith.constant dense<0.000000e+00> : vector<1x256xf32>
    %18 = tpu.matmul %11, %17, %cst_10 {dimension_numbers = #tpu.dot_dimension_numbers<[1], [0], [0], [1], [0, 0, 1, 1], [], []>} : vector<1x128xf32>, vector<128x256xf32>, vector<1x256xf32> -> vector<1x256xf32>
    %19 = arith.addf %16, %18 : vector<1x256xf32>
    %c0_11 = arith.constant 0 : index
    %c0_12 = arith.constant 0 : index
    %20 = vector.load %arg4[%c0_11, %c0_12] : memref<1x256xf32, #tpu.memory_space<vmem>>, vector<1x256xf32>
    %21 = arith.addf %19, %20 : vector<1x256xf32>
    %22 = vector.extract_strided_slice %21 {offsets = [0, 0], sizes = [1, 128], strides = [1, 1]} : vector<1x256xf32> to vector<1x128xf32>
    %23 = vector.extract_strided_slice %21 {offsets = [0, 128], sizes = [1, 128], strides = [1, 1]} : vector<1x256xf32> to vector<1x128xf32>
    %c2_i32 = arith.constant 2 : i32
    %24 = arith.index_cast %c2_i32 : i32 to index
    %25 = memref.load %arg0[%24] : memref<4xi32, #tpu.memory_space<smem>>
    %26 = arith.index_cast %25 : i32 to index
    %c0_13 = arith.constant 0 : index
    %27 = vector.load %arg2[%26, %c0_13] : memref<32x256xf32, #tpu.memory_space<vmem>>, vector<1x256xf32>
    %c0_14 = arith.constant 0 : index
    %c0_15 = arith.constant 0 : index
    %28 = vector.load %arg3[%c0_14, %c0_15] : memref<128x256xf32, #tpu.memory_space<vmem>>, vector<128x256xf32>
    %cst_16 = arith.constant dense<0.000000e+00> : vector<1x256xf32>
    %29 = tpu.matmul %22, %28, %cst_16 {dimension_numbers = #tpu.dot_dimension_numbers<[1], [0], [0], [1], [0, 0, 1, 1], [], []>} : vector<1x128xf32>, vector<128x256xf32>, vector<1x256xf32> -> vector<1x256xf32>
    %30 = arith.addf %27, %29 : vector<1x256xf32>
    %c0_17 = arith.constant 0 : index
    %c0_18 = arith.constant 0 : index
    %31 = vector.load %arg4[%c0_17, %c0_18] : memref<1x256xf32, #tpu.memory_space<vmem>>, vector<1x256xf32>
    %32 = arith.addf %30, %31 : vector<1x256xf32>
    %33 = vector.extract_strided_slice %32 {offsets = [0, 0], sizes = [1, 128], strides = [1, 1]} : vector<1x256xf32> to vector<1x128xf32>
    %34 = vector.extract_strided_slice %32 {offsets = [0, 128], sizes = [1, 128], strides = [1, 1]} : vector<1x256xf32> to vector<1x128xf32>
    %c3_i32 = arith.constant 3 : i32
    %35 = arith.index_cast %c3_i32 : i32 to index
    %36 = memref.load %arg0[%35] : memref<4xi32, #tpu.memory_space<smem>>
    %37 = arith.index_cast %36 : i32 to index
    %c0_19 = arith.constant 0 : index
    %38 = vector.load %arg2[%37, %c0_19] : memref<32x256xf32, #tpu.memory_space<vmem>>, vector<1x256xf32>
    %c0_20 = arith.constant 0 : index
    %c0_21 = arith.constant 0 : index
    %39 = vector.load %arg3[%c0_20, %c0_21] : memref<128x256xf32, #tpu.memory_space<vmem>>, vector<128x256xf32>
    %cst_22 = arith.constant dense<0.000000e+00> : vector<1x256xf32>
    %40 = tpu.matmul %33, %39, %cst_22 {dimension_numbers = #tpu.dot_dimension_numbers<[1], [0], [0], [1], [0, 0, 1, 1], [], []>} : vector<1x128xf32>, vector<128x256xf32>, vector<1x256xf32> -> vector<1x256xf32>
    %41 = arith.addf %38, %40 : vector<1x256xf32>
    %c0_23 = arith.constant 0 : index
    %c0_24 = arith.constant 0 : index
    %42 = vector.load %arg4[%c0_23, %c0_24] : memref<1x256xf32, #tpu.memory_space<vmem>>, vector<1x256xf32>
    %43 = arith.addf %41, %42 : vector<1x256xf32>
    %44 = vector.extract_strided_slice %43 {offsets = [0, 0], sizes = [1, 128], strides = [1, 1]} : vector<1x256xf32> to vector<1x128xf32>
    %45 = vector.extract_strided_slice %43 {offsets = [0, 128], sizes = [1, 128], strides = [1, 1]} : vector<1x256xf32> to vector<1x128xf32>
    %c4_i32 = arith.constant 4 : i32
    %c0_25 = arith.constant 0 : index
    %c0_26 = arith.constant 0 : index
    %46 = vector.load %arg6[%c0_25, %c0_26] : memref<1x128xf32, #tpu.memory_space<vmem>>, vector<1x128xf32>
    tpu.vector_store %arg6[%c0_25, %c0_26], %44 {strides = array<i32>} : memref<1x128xf32, #tpu.memory_space<vmem>>, vector<1x128xf32>,
    %47 = tpu.iota {dimensions = array<i32: 1>} : vector<1x128xi32>
    %c2_i32_27 = arith.constant 2 : i32
    %48 = vector.broadcast %c2_i32_27 : i32 to vector<1x128xi32>
    %49 = arith.cmpi slt, %47, %48 : vector<1x128xi32>
    %cst_28 = arith.constant -1.000000e+30 : f32
    %50 = vector.broadcast %cst_28 : f32 to vector<1x128xf32>
    %51 = arith.select %49, %45, %50 : vector<1x128xi1>, vector<1x128xf32>
    %cst_29 = arith.constant dense<0xFF800000> : vector<1xf32>
    %52 = vector.multi_reduction <maximumf>, %51, %cst_29 [1] : vector<1x128xf32> to vector<1xf32>
    %53 = vector.shape_cast %52 : vector<1xf32> to vector<1x1xf32>
    %54 = vector.broadcast %53 : vector<1x1xf32> to vector<1x128xf32>
    %55 = arith.subf %51, %54 : vector<1x128xf32>
    %56 = math.exp %55 : vector<1x128xf32>
    %cst_30 = arith.constant dense<0.000000e+00> : vector<1xf32>
    %57 = vector.multi_reduction <add>, %56, %cst_30 [1] : vector<1x128xf32> to vector<1xf32>
    %58 = vector.shape_cast %57 : vector<1xf32> to vector<1x1xf32>
    %59 = math.log %58 : vector<1x1xf32>
    %60 = arith.addf %59, %53 : vector<1x1xf32>
    %61 = vector.broadcast %60 : vector<1x1xf32> to vector<1x128xf32>
    %62 = arith.subf %51, %61 : vector<1x128xf32>
    %c0_31 = arith.constant 0 : index
    %c0_32 = arith.constant 0 : index
    %63 = vector.load %arg5[%c0_31, %c0_32] : memref<1x128xf32, #tpu.memory_space<vmem>>, vector<1x128xf32>
    tpu.vector_store %arg5[%c0_31, %c0_32], %62 {strides = array<i32>} : memref<1x128xf32, #tpu.memory_space<vmem>>, vector<1x128xf32>,
    return
  }
}

</mosaic_0001>

<bundles_post_ra>
// kernel: rnn_forward_word.1
= control target key start
LH: loop header
LB: loop body
LE: loop exit
PB: predicated region body
PF: predicated region fallthrough
CT: control target
= control target key end

     0   :  { %12 = vsyncpa [#allocation5], 0  ;;  %s845_s0 = inlined_call_operand.hbm [shape: s32[4], index: 0, kind: input, shape index: {}]   ;;  %s846_s1 = inlined_call_operand.hbm [shape: f32[1,128], index: 1, kind: input, shape index: {}]   ;;  %s847_s2 = inlined_call_operand.hbm [shape: f32[32,256], index: 2, kind: input, shape index: {}]   ;;  %s848_s3 = inlined_call_operand.hbm [shape: f32[128,256], index: 3, kind: input, shape index: {}]   ;;  %s849_s4 = inlined_call_operand.vmem [shape: f32[1,256], index: 4, kind: input, shape index: {}]   ;;  %s850_s5 = inlined_call_operand.hbm [shape: f32[1,128], index: 5, kind: output, shape index: {0}]   ;;  %s851_s6 = inlined_call_operand.hbm [shape: f32[1,128], index: 6, kind: output, shape index: {1}]  }
   0x1   :  { %13 = vsyncpa [#allocation3], 0 }
   0x2   :  { %14 = vsyncpa [#allocation8], 0 }
   0x3   :  { %15 = vsyncpa [#allocation4], 0  ;;  %s41_s23 = sshll.u32 %s847_s2, 4  ;;  %s42_s23 = int_to_ptr.hbm [resolvable:$true] %s41_s23 }
   0x4   :  { %16 = vsyncpa [#allocation12], 0  ;;  %s583_s24 = smov [#allocation7]   ;;  %s22_s28 = sshll.u32 %s845_s0, 4  ;;  %s23_s28 = int_to_ptr.hbm [resolvable:$true] %s22_s28 }
   0x5   :  { %s43_s25 = sshll.u32 %s583_s24, 4  ;;  %s584_s29 = smov 256   ;;  %s44_s25 = int_to_ptr.vmem [resolvable:$true] %s43_s25 }
   0x6   :  { %s585_s30 = smov 16   ;;  %s586_s7 = smov [#allocation2]  }
   0x7   :  { %49 = dma.hbm_to_vmem [thread:$0]  %s42_s23, 1024, %s44_s25, [#allocation8], %s584_s29, %s584_s29, %s585_s30  }
   0x8   :  { %25 = dma.hbm_to_smem %s23_s28, 16, %s586_s7, [#allocation5]  }
   0x9   :  { %s31_s10 = sshll.u32 %s846_s1, 4  ;;  %s587_s2 = smov [#allocation6]   ;;  %s32_s10 = int_to_ptr.hbm [resolvable:$true] %s31_s10 }
   0xa   :  { %s33_s11 = sshll.u32 %s587_s2, 4  ;;  %s54_s14 = sshll.u32 %s848_s3, 4  ;;  %s34_s11 = int_to_ptr.vmem [resolvable:$true] %s33_s11  ;;  %s55_s14 = int_to_ptr.hbm [resolvable:$true] %s54_s14 }
   0xb   :  { %36 = dma.hbm_to_vmem [thread:$0]  %s32_s10, 16, %s34_s11, [#allocation3]  }
   0xc   :  { %s588_s0 = smov [#allocation9]  }
   0xd   :  { %s56_s15 = sshll.u32 %s588_s0, 4  ;;  %s57_s15 = int_to_ptr.vmem [resolvable:$true] %s56_s15 }
   0xe   :  { %62 = dma.hbm_to_vmem [thread:$0]  %s55_s14, 4096, %s57_s15, [#allocation8], %s584_s29, %s584_s29, %s585_s30  }
   0xf   :  { %573 = dma.done.wait [#allocation5], 16  }
  0x10   :  { %574 = vsyncadd [#allocation5], 4294967280 }
  0x11   :  { %575 = dma.done.wait [#allocation3], 16  }
  0x12   :  { %576 = vsyncadd [#allocation3], 4294967280 }
  0x13   :  { %577 = dma.done.wait [#allocation8], 5120  }
  0x14   :  { %578 = vsyncadd [#allocation8], 4294962176 }
  0x15   :  { %81 = sfence }
  0x16   :  { %v638_v0 = vld [vmem:[#allocation9 + $0xf8] sm:$0xff]  ;;  %v640_v1 = vld [vmem:[#allocation9 + $0xf0] sm:$0xff]  ;;  %v642_v2 = vld [vmem:[#allocation9 + $0xe8] sm:$0xff]  ;;  %s83_s1 = sld [smem:[#allocation2]]  ;;  %vm168_vm0 = vcmask 1040384   ;;  %v346_v55 = vlaneseq  ;;  %s589_s14 = smov [#allocation11]  }
  0x17   :  { %145 = vmatpush.msra.mxu1 %v638_v0  ;;  %125 = vmatpush.msra.mxu0 %v640_v1  ;;  %v646_v3 = vld [vmem:[#allocation9 + $0xe0] sm:$0xff]  ;;  %v648_v4 = vld [vmem:[#allocation9 + $0xd8] sm:$0xff]  ;;  %v650_v5 = vld [vmem:[#allocation9 + $0xd0] sm:$0xff]  ;;  %s416_s22 = sld [smem:[#allocation2 + $0x1]]  ;;  %s383_s0 = sshll.u32 %s589_s14, 4  ;;  %s384_s0 = int_to_ptr.vmem [resolvable:$true] %s383_s0 }
  0x18   :  { %184 = vmatpush.msra.mxu2 %v640_v1  ;;  %204 = vmatpush.msra.mxu3 %v638_v0  ;;  %v656_v6 = vld [vmem:[#allocation9 + $0xc8] sm:$0xff]  ;;  %v658_v7 = vld [vmem:[#allocation9 + $0xc0] sm:$0xff]  ;;  %v664_v8 = vld [vmem:[#allocation9 + $0xb8] sm:$0xff]  ;;  %s422_s9 = sld [smem:[#allocation2 + $0x3]]  ;;  %v347_v61 = vand.u32 127, %v346_v55  ;;  %s374_s20 = sshll.u32 %s850_s5, 4  ;;  %s375_s20 = int_to_ptr.hbm [resolvable:$true] %s374_s20 }
  0x19   :  { %146 = vmatpush.msra.mxu1 %v642_v2  ;;  %126 = vmatpush.msra.mxu0 %v646_v3  ;;  %v666_v9 = vld [vmem:[#allocation9 + $0xb0] sm:$0xff]  ;;  %v672_v10 = vld [vmem:[#allocation9 + $0xa8] sm:$0xff]  ;;  %v674_v11 = vld [vmem:[#allocation9 + $0xa0] sm:$0xff] }
  0x1a   :  { %185 = vmatpush.msra.mxu2 %v646_v3  ;;  %205 = vmatpush.msra.mxu3 %v642_v2  ;;  %v680_v12 = vld [vmem:[#allocation9 + $0x98] sm:$0xff]  ;;  %v682_v13 = vld [vmem:[#allocation9 + $0x90] sm:$0xff]  ;;  %v688_v14 = vld [vmem:[#allocation9 + $0x88] sm:$0xff]  ;;  %vm348_vm1 = vcmp.lt.s32.totalorder %v347_v61, 2 }
  0x1b   :  { %147 = vmatpush.msra.mxu1 %v648_v4  ;;  %127 = vmatpush.msra.mxu0 %v650_v5  ;;  %v690_v15 = vld [vmem:[#allocation9 + $0x80] sm:$0xff]  ;;  %v696_v16 = vld [vmem:[#allocation9 + $0x78] sm:$0xff]  ;;  %v698_v17 = vld [vmem:[#allocation9 + $0x70] sm:$0xff] }
  0x1c   :  { %186 = vmatpush.msra.mxu2 %v650_v5  ;;  %206 = vmatpush.msra.mxu3 %v648_v4  ;;  %v704_v18 = vld [vmem:[#allocation9 + $0x68] sm:$0xff]  ;;  %v706_v19 = vld [vmem:[#allocation9 + $0x60] sm:$0xff]  ;;  %v712_v20 = vld [vmem:[#allocation9 + $0x58] sm:$0xff]  ;;  %s84_s3 = sshra.s32 %s83_s1, 3  ;;  %s87_s16 = sand.u32 7, %s83_s1 }
  0x1d   :  { %148 = vmatpush.msra.mxu1 %v656_v6  ;;  %128 = vmatpush.msra.mxu0 %v658_v7  ;;  %v714_v21 = vld [vmem:[#allocation9 + $0x50] sm:$0xff]  ;;  %v720_v22 = vld [vmem:[#allocation9 + $0x48] sm:$0xff]  ;;  %v722_v23 = vld [vmem:[#allocation9 + $0x40] sm:$0xff]  ;;  %s425_s17 = sshll.u32 %s84_s3, 4  ;;  %s175_s23 = sshra.s32 %s416_s22, 3 }
  0x1e   :  { %187 = vmatpush.msra.mxu2 %v658_v7  ;;  %207 = vmatpush.msra.mxu3 %v656_v6  ;;  %v728_v24 = vld [vmem:[#allocation9 + $0x38] sm:$0xff]  ;;  %v730_v25 = vld [vmem:[#allocation9 + $0x30] sm:$0xff]  ;;  %v736_v26 = vld [vmem:[#allocation9 + $0x28] sm:$0xff]  ;;  %s90_s18 = sadd.s32 %s425_s17, %s87_s16  ;;  %s178_s24 = sand.u32 7, %s416_s22 }
  0x1f   :  { %149 = vmatpush.msra.mxu1 %v664_v8  ;;  %129 = vmatpush.msra.mxu0 %v666_v9  ;;  %v738_v27 = vld [vmem:[#allocation9 + $0x20] sm:$0xff]  ;;  %v744_v28 = vld [vmem:[#allocation9 + $0x18] sm:$0xff]  ;;  %v746_v29 = vld [vmem:[#allocation9 + $0x10] sm:$0xff]  ;;  %s91_s19 = scalar_lea.vmem [#allocation7], %s90_s18  ;;  %s426_s25 = sshll.u32 %s175_s23, 4 }
  0x20   :  { %188 = vmatpush.msra.mxu2 %v666_v9  ;;  %208 = vmatpush.msra.mxu3 %v664_v8  ;;  %v752_v30 = vld [vmem:[#allocation9 + $0x8] sm:$0xff]  ;;  %v754_v31 = vld [vmem:[#allocation9] sm:$0xff]  ;;  %v82_v32 = vld [vmem:[#allocation6] sm:$0x1]  ;;  %s181_s26 = sadd.s32 %s426_s25, %s178_s24  ;;  %s289_s10 = sshra.s32 %s422_s9, 3 }
  0x21   :  { %150 = vmatpush.msra.mxu1 %v672_v10  ;;  %130 = vmatpush.msra.mxu0 %v674_v11  ;;  %v92_v36 = vld [vmem:[%s91_s19] ss:$8 sm:$0x3]  ;;  %s182_s27 = scalar_lea.vmem [#allocation7], %s181_s26  ;;  %s292_s2 = sand.u32 7, %s422_s9 }
  0x22   :  { %189 = vmatpush.msra.mxu2 %v674_v11  ;;  %209 = vmatpush.msra.mxu3 %v672_v10  ;;  %v172_v38 = vld [vmem:[%s849_s4] sm:$0x3]  ;;  %s419_s4 = sld [smem:[#allocation2 + $0x2]]  ;;  %s428_s11 = sshll.u32 %s289_s10, 4 }
  0x23   :  { %151 = vmatpush.msra.mxu1 %v680_v12  ;;  %131 = vmatpush.msra.mxu0 %v682_v13  ;;  %v183_v43 = vld [vmem:[%s182_s27] ss:$8 sm:$0x3]  ;;  %s295_s12 = sadd.s32 %s428_s11, %s292_s2  ;;  %s385_s3 = sshll.u32 %s851_s6, 4  ;;  %s386_s3 = int_to_ptr.hbm [resolvable:$true] %s385_s3 }
  0x24   :  { %190 = vmatpush.msra.mxu2 %v682_v13  ;;  %210 = vmatpush.msra.mxu3 %v680_v12  ;;  %s296_s13 = scalar_lea.vmem [#allocation7], %s295_s12  ;;  %s590_s16 = smov [#allocation10]  }
  0x25   :  { %152 = vmatpush.msra.mxu1 %v688_v14  ;;  %132 = vmatpush.msra.mxu0 %v690_v15  ;;  %v297_v57 = vld [vmem:[%s296_s13] ss:$8 sm:$0x3]  ;;  %s372_s17 = sshll.u32 %s590_s16, 4  ;;  %s373_s17 = int_to_ptr.vmem [resolvable:$true] %s372_s17 }
  0x26   :  { %191 = vmatpush.msra.mxu2 %v690_v15  ;;  %211 = vmatpush.msra.mxu3 %v688_v14 }
  0x27   :  { %153 = vmatpush.msra.mxu1 %v696_v16  ;;  %133 = vmatpush.msra.mxu0 %v698_v17 }
  0x28   :  { %192 = vmatpush.msra.mxu2 %v698_v17  ;;  %212 = vmatpush.msra.mxu3 %v696_v16  ;;  %s232_s28 = sshra.s32 %s419_s4, 3  ;;  %s235_s29 = sand.u32 7, %s419_s4 }
  0x29   :  { %154 = vmatpush.msra.mxu1 %v704_v18  ;;  %134 = vmatpush.msra.mxu0 %v706_v19  ;;  %s427_s30 = sshll.u32 %s232_s28, 4 }
  0x2a   :  { %193 = vmatpush.msra.mxu2 %v706_v19  ;;  %213 = vmatpush.msra.mxu3 %v704_v18  ;;  %s238_s7 = sadd.s32 %s427_s30, %s235_s29 }
  0x2b   :  { %155 = vmatpush.msra.mxu1 %v712_v20  ;;  %135 = vmatpush.msra.mxu0 %v714_v21  ;;  %s239_s8 = scalar_lea.vmem [#allocation7], %s238_s7 }
  0x2c   :  { %194 = vmatpush.msra.mxu2 %v714_v21  ;;  %214 = vmatpush.msra.mxu3 %v712_v20  ;;  %v240_v49 = vld [vmem:[%s239_s8] ss:$8 sm:$0x3] }
  0x2d   :  { %156 = vmatpush.msra.mxu1 %v720_v22  ;;  %136 = vmatpush.msra.mxu0 %v722_v23 }
  0x2e   :  { %195 = vmatpush.msra.mxu2 %v722_v23  ;;  %215 = vmatpush.msra.mxu3 %v720_v22 }
  0x2f   :  { %157 = vmatpush.msra.mxu1 %v728_v24  ;;  %137 = vmatpush.msra.mxu0 %v730_v25 }
  0x30   :  { %196 = vmatpush.msra.mxu2 %v730_v25  ;;  %216 = vmatpush.msra.mxu3 %v728_v24 }
  0x31   :  { %158 = vmatpush.msra.mxu1 %v736_v26  ;;  %138 = vmatpush.msra.mxu0 %v738_v27 }
  0x32   :  { %197 = vmatpush.msra.mxu2 %v738_v27  ;;  %217 = vmatpush.msra.mxu3 %v736_v26 }
  0x33   :  { %159 = vmatpush.msra.mxu1 %v744_v28  ;;  %139 = vmatpush.msra.mxu0 %v746_v29 }
  0x34   :  { %198 = vmatpush.msra.mxu2 %v746_v29  ;;  %218 = vmatpush.msra.mxu3 %v744_v28 }
  0x35   :  { %160 = vmatpush.msra.mxu1 %v752_v30  ;;  %140 = vmatpush.msra.mxu0 %v754_v31 }
  0x36   :  { %161 = vmatmul.f32.vlgmr.msra.gmra.mxu1 %v82_v32  ;;  %141 = vmatmul.f32.vlgmr.msra.gmra.mxu0 %v82_v32 }
  0x37   :  { %199 = vmatpush.msra.mxu2 %v754_v31  ;;  %219 = vmatpush.msra.mxu3 %v752_v30 }
  0x38   :  { %241 = vmatpush.msrb.mxu0 %v640_v1  ;;  %261 = vmatpush.msrb.mxu1 %v638_v0 }
  0x39   :  { %298 = vmatpush.msrb.mxu2 %v640_v1  ;;  %318 = vmatpush.msrb.mxu3 %v638_v0 }
  0x3a   :  { %242 = vmatpush.msrb.mxu0 %v646_v3  ;;  %262 = vmatpush.msrb.mxu1 %v642_v2 }
  0x3b   :  { %299 = vmatpush.msrb.mxu2 %v646_v3  ;;  %319 = vmatpush.msrb.mxu3 %v642_v2 }
  0x3c   :  { %243 = vmatpush.msrb.mxu0 %v650_v5  ;;  %263 = vmatpush.msrb.mxu1 %v648_v4 }
  0x3d   :  { %300 = vmatpush.msrb.mxu2 %v650_v5  ;;  %320 = vmatpush.msrb.mxu3 %v648_v4 }
  0x3e   :  { %244 = vmatpush.msrb.mxu0 %v658_v7  ;;  %264 = vmatpush.msrb.mxu1 %v656_v6 }
  0x3f   :  { %301 = vmatpush.msrb.mxu2 %v658_v7  ;;  %321 = vmatpush.msrb.mxu3 %v656_v6 }
  0x40   :  { %245 = vmatpush.msrb.mxu0 %v666_v9  ;;  %265 = vmatpush.msrb.mxu1 %v664_v8 }
  0x41   :  { %302 = vmatpush.msrb.mxu2 %v666_v9  ;;  %322 = vmatpush.msrb.mxu3 %v664_v8 }
  0x42   :  { %246 = vmatpush.msrb.mxu0 %v674_v11  ;;  %266 = vmatpush.msrb.mxu1 %v672_v10 }
  0x43   :  { %303 = vmatpush.msrb.mxu2 %v674_v11  ;;  %323 = vmatpush.msrb.mxu3 %v672_v10 }
  0x44   :  { %247 = vmatpush.msrb.mxu0 %v682_v13  ;;  %267 = vmatpush.msrb.mxu1 %v680_v12 }
  0x45   :  { %304 = vmatpush.msrb.mxu2 %v682_v13  ;;  %324 = vmatpush.msrb.mxu3 %v680_v12 }
  0x46   :  { %248 = vmatpush.msrb.mxu0 %v690_v15  ;;  %268 = vmatpush.msrb.mxu1 %v688_v14 }
  0x47   :  { %305 = vmatpush.msrb.mxu2 %v690_v15  ;;  %325 = vmatpush.msrb.mxu3 %v688_v14 }
  0x48   :  { %249 = vmatpush.msrb.mxu0 %v698_v17  ;;  %269 = vmatpush.msrb.mxu1 %v696_v16 }
  0x49   :  { %306 = vmatpush.msrb.mxu2 %v698_v17  ;;  %326 = vmatpush.msrb.mxu3 %v696_v16 }
  0x4a   :  { %250 = vmatpush.msrb.mxu0 %v706_v19  ;;  %270 = vmatpush.msrb.mxu1 %v704_v18 }
  0x4b   :  { %307 = vmatpush.msrb.mxu2 %v706_v19  ;;  %327 = vmatpush.msrb.mxu3 %v704_v18 }
  0x4c   :  { %251 = vmatpush.msrb.mxu0 %v714_v21  ;;  %271 = vmatpush.msrb.mxu1 %v712_v20 }
  0x4d   :  { %308 = vmatpush.msrb.mxu2 %v714_v21  ;;  %328 = vmatpush.msrb.mxu3 %v712_v20 }
  0x4e   :  { %252 = vmatpush.msrb.mxu0 %v722_v23  ;;  %272 = vmatpush.msrb.mxu1 %v720_v22 }
  0x4f   :  { %309 = vmatpush.msrb.mxu2 %v722_v23  ;;  %329 = vmatpush.msrb.mxu3 %v720_v22 }
  0x50   :  { %253 = vmatpush.msrb.mxu0 %v730_v25  ;;  %273 = vmatpush.msrb.mxu1 %v728_v24 }
  0x51   :  { %310 = vmatpush.msrb.mxu2 %v730_v25  ;;  %330 = vmatpush.msrb.mxu3 %v728_v24 }
  0x52   :  { %254 = vmatpush.msrb.mxu0 %v738_v27  ;;  %274 = vmatpush.msrb.mxu1 %v736_v26 }
  0x53   :  { %311 = vmatpush.msrb.mxu2 %v738_v27  ;;  %331 = vmatpush.msrb.mxu3 %v736_v26 }
  0x54   :  { %255 = vmatpush.msrb.mxu0 %v746_v29  ;;  %275 = vmatpush.msrb.mxu1 %v744_v28 }
  0x55   :  { %312 = vmatpush.msrb.mxu2 %v746_v29  ;;  %332 = vmatpush.msrb.mxu3 %v744_v28 }
  0x56   :  { %256 = vmatpush.msrb.mxu0 %v754_v31  ;;  %276 = vmatpush.msrb.mxu1 %v752_v30 }
  0x57   :  { %313 = vmatpush.msrb.mxu2 %v754_v31  ;;  %333 = vmatpush.msrb.mxu3 %v752_v30 }
  0xb3   :  { %v162_v33 = vpop.f32.mrf.mxu1  ;;  %v142_v34 = vpop.f32.mrf.mxu0 }
  0xb4   :  { %v167_v35 = vrot.slane %v162_v33, 7 }
  0xb6   :  { %v169_v37 = vsel %vm168_vm0, %v142_v34, %v167_v35 }
  0xb7   :  { %v171_v39 = vadd.f32 %v169_v37, %v92_v36 }
  0xb9   :  { %v173_v40 = vadd.f32 %v172_v38, %v171_v39 }
  0xbb   :  { %200 = vmatmul.f32.vlgmr.msra.gmra.mxu2 %v173_v40  ;;  %220 = vmatmul.f32.vlgmr.msra.gmra.mxu3 %v173_v40 }
 0x13e   :  { %v221_v41 = vpop.f32.mrf.mxu3  ;;  %v201_v44 = vpop.f32.mrf.mxu2 }
 0x13f   :  { %v226_v42 = vrot.slane %v221_v41, 7 }
 0x141   :  { %v227_v45 = vsel %vm168_vm0, %v201_v44, %v226_v42 }
 0x142   :  { %v229_v46 = vadd.f32 %v227_v45, %v183_v43 }
 0x144   :  { %v230_v47 = vadd.f32 %v229_v46, %v172_v38 }
 0x146   :  { %257 = vmatmul.f32.vlgmr.msrb.gmra.mxu0 %v230_v47  ;;  %277 = vmatmul.f32.vlgmr.msrb.gmra.mxu1 %v230_v47 }
 0x1c3   :  { %v278_v48 = vpop.f32.mrf.mxu1  ;;  %v258_v51 = vpop.f32.mrf.mxu0 }
 0x1c4   :  { %v283_v50 = vrot.slane %v278_v48, 7 }
 0x1c6   :  { %v284_v52 = vsel %vm168_vm0, %v258_v51, %v283_v50 }
 0x1c7   :  { %v286_v53 = vadd.f32 %v284_v52, %v240_v49 }
 0x1c9   :  { %v287_v54 = vadd.f32 %v286_v53, %v172_v38 }
 0x1cb   :  { %314 = vmatmul.f32.vlgmr.msrb.gmra.mxu2 %v287_v54  ;;  %334 = vmatmul.f32.vlgmr.msrb.gmra.mxu3 %v287_v54 }
 0x24e   :  { %v335_v56 = vpop.f32.mrf.mxu3  ;;  %v315_v59 = vpop.f32.mrf.mxu2 }
 0x24f   :  { %v340_v58 = vrot.slane %v335_v56, 7 }
 0x251   :  { %v341_v60 = vsel %vm168_vm0, %v315_v59, %v340_v58 }
 0x252   :  { %v343_v62 = vadd.f32 %v341_v60, %v297_v57 }
 0x254   :  { %v344_v63 = vadd.f32 %v343_v62, %v172_v38 }
 0x256   :  { %v350_v0 = vperm.slane %v344_v63, 1  ;;  %345 = vst [vmem:[#allocation11] sm:$0x1] %v344_v63 }
 0x257   :  { %388 = dma.vmem_to_hbm [thread:$0]  %s384_s0, 16, %s386_s3, [#allocation12]  }
 0x258   :  { %v352_v1 = vsel %vm348_vm1, %v350_v0, -1e+30 }
 0x259   :  { %v353_v2 = vsel %vm168_vm0, %v352_v1, -inf }
 0x25a   :  { %354 = vmax.xlane.f32.xlu0 %v353_v2 }
 0x2cd   :  { %v355_v3 = vpop.xlane.xlu0 %354 }
 0x2ce   :  { %v356_v4 = vsub.f32 %v352_v1, %v355_v3 }
 0x2d0   :  { %v357_v5 = vmul.f32 1.442695, %v356_v4 }
 0x2d2   :  { %437 = vpow2.f32 %v357_v5 }
 0x2d8   :  { %v438_v6 = vpop.eup %437 }
 0x2d9   :  { %v359_v7 = vsel %vm168_vm0, %v438_v6, 0.0 }
 0x2da   :  { %360 = vadd.xlane.f32.xlu0 %v359_v7 }
 0x34d   :  { %v361_v8 = vpop.xlane.xlu0 %360 }
 0x34e   :  { %439 = vlog2.f32 %v361_v8 }
 0x354   :  { %v440_v9 = vpop.eup %439 }
 0x355   :  { %v363_v10 = vmul.f32 0.6931472, %v440_v9 }
 0x357   :  { %v364_v11 = vadd.f32 %v363_v10, %v355_v3 }
 0x359   :  { %v365_v12 = vsub.f32 %v352_v1, %v364_v11 }
 0x35b   :  { %366 = vst [vmem:[#allocation10] sm:$0x1] %v365_v12 }
 0x35c   :  { %377 = dma.vmem_to_hbm [thread:$0]  %s373_s17, 16, %s375_s20, [#allocation4]  }
 0x35d   :  { %579 = dma.done.wait [#allocation4], 16  }
 0x35e   :  { %580 = vsyncadd [#allocation4], 4294967280 }
 0x35f   :  { %581 = dma.done.wait [#allocation12], 16  }
 0x360   :  { %582 = vsyncadd [#allocation12], 4294967280 }
 0x361   :  { %397 = vsyncpa [#allocation3], 1 }
 0x362   :  { %398 = vsyncpa [#allocation8], 1 }
 0x363   :  { %399 = vsyncpa [#allocation4], 1 }
 0x364   :  { %400 = vsyncpa [#allocation12], 1 }
 0x365   :  { %401 = vsyncpa [#allocation5], 1 }

</bundles_post_ra>
